<compile_context>
chip_gen: v7x
topology: tpu7x:2x2x1
jax: 0.10.0
libtpu: 0.0.40
codegen_flags: <defaults>
</compile_context>

<pallas_src>
import jax
import jax.numpy as jnp
from jax import lax
from jax.experimental import pallas as pl
from jax.experimental.pallas import tpu as pltpu


# ---------------------------------------------------------------------------
# Kernels
# ---------------------------------------------------------------------------

def _sae_resident_kernel(x_ref, we_ref, be_ref, wd_ref, bd_ref, rec_ref, enc_ref):
    """Mode A: full weight matrices resident in VMEM; grid = (batch tiles,).

    x_ref  : (tb, D)   we_ref : (H, D)   be_ref : (1, H)
    wd_ref : (D, H)    bd_ref : (1, D)
    rec_ref: (tb, D)   enc_ref: (tb, H)
    """
    # Encoder: contract the shared last dim directly on the MXU (no transposes).
    h = lax.dot_general(
        x_ref[...], we_ref[...],
        dimension_numbers=(((1,), (1,)), ((), ())),
        preferred_element_type=jnp.float32,
    )
    enc = jnp.maximum(h + be_ref[...], 0.0)                     # (tb, H)
    enc_ref[...] = enc.astype(enc_ref.dtype)

    # Decoder: (tb, H) . (D, H)^T -> (tb, D), f32 accumulation on the MXU.
    rec = lax.dot_general(
        enc.astype(wd_ref.dtype), wd_ref[...],
        dimension_numbers=(((1,), (1,)), ((), ())),
        preferred_element_type=jnp.float32,
    )
    rec_ref[...] = (rec + bd_ref[...]).astype(rec_ref.dtype)


def _sae_streamed_kernel(x_ref, we_ref, be_ref, wdt_ref, bd_ref, rec_ref, enc_ref):
    """Mode B: weights streamed in (th, D) panels; grid = (batch, hidden).

    Hidden (reduction) axis is last; the reconstruction accumulates directly
    into the VMEM-resident rec_ref output block (no scratch accumulator).

    x_ref  : (tb, D)   we_ref : (th, D)   be_ref : (1, th)
    wdt_ref: (th, D)   bd_ref : (1, D)    (W_dec re-laid-out to (H, D))
    rec_ref: (tb, D) f32 (resident accumulator)   enc_ref: (tb, th)
    """
    h_idx = pl.program_id(1)

    @pl.when(h_idx == 0)
    def _init():
        rec_ref[...] = jnp.broadcast_to(bd_ref[...], rec_ref.shape)

    enc = jnp.maximum(
        lax.dot_general(
            x_ref[...], we_ref[...],
            dimension_numbers=(((1,), (1,)), ((), ())),
            preferred_element_type=jnp.float32,
        ) + be_ref[...],
        0.0,
    )                                                           # (tb, th)
    enc_ref[...] = enc.astype(enc_ref.dtype)

    # Decoder partial sum: (tb, th) . (th, D) -> (tb, D); contiguous panel.
    rec_ref[...] += lax.dot_general(
        enc.astype(wdt_ref.dtype), wdt_ref[...],
        dimension_numbers=(((1,), (0,)), ((), ())),
        preferred_element_type=jnp.float32,
    )


# ---------------------------------------------------------------------------
# Wrapper / tile selection
# ---------------------------------------------------------------------------

def _vmem_capacity_bytes():
    """Physical VMEM capacity (128 MiB v5e/v6e, 64 MiB v7x); conservative fallback."""
    try:
        info = pltpu.get_tpu_info()
        cap = getattr(info, "vmem_capacity_bytes", None)
        if cap:
            return int(cap)
    except Exception:
        pass
    return 64 * 1024 * 1024


def _pick_tile(total, preferred, align):
    """Largest multiple of `align` that divides `total` and is <= `preferred`;
    falls back to the full extent (single block along that axis)."""
    if total <= preferred or total % align != 0:
        return total
    t = min(preferred - preferred % align, total - total % align)
    while t >= align:
        if total % t == 0:
            return t
        t -= align
    return total


def sparse_autoencoder_forward(x, w_enc, b_enc, w_dec, b_dec, *,
                               compute_dtype=jnp.float32,
                               encoded_dtype=jnp.float32,
                               block_b=None, block_h=None,
                               force_pallas=False):
    """SparseAutoencoder forward.

    x: (B, D); w_enc: (H, D); b_enc: (H,); w_dec: (D, H); b_dec: (D,)
    (torch.nn.Linear layout: (out_features, in_features)).

    Returns (reconstructed (B, D) float32, encoded (B, H) `encoded_dtype`).

    compute_dtype=bfloat16 halves weight HBM traffic and doubles MXU rate on
    every TPU generation (v5e/v6e/v7x all take bf16 MXU operands).  It down-
    casts the encoded activations before the decoder matmul, so reconstruction
    deviates from the f32 reference at ~1e-2 level (intentional trade-off).
    """
    B, D = x.shape
    H = w_enc.shape[0]
    assert w_enc.shape == (H, D) and w_dec.shape == (D, H)
    assert b_enc.shape == (H,) and b_dec.shape == (D,)

    # Tiny problems (module defaults D=16, H=128): <128-lane output -> masked
    # partial stores, ~12% MXU K utilisation, ~0.35us/grid-step overhead; fused
    # XLA wins on every generation, so skip the kernel unless forced.
    if not force_pallas and (D < 128 or B * D * H < (1 << 22)):
        enc = jnp.maximum(x @ w_enc.T + b_enc, 0.0)
        rec = enc @ w_dec.T + b_dec
        return rec.astype(jnp.float32), enc.astype(encoded_dtype)

    itemsize = jnp.dtype(compute_dtype).itemsize
    enc_itemsize = jnp.dtype(encoded_dtype).itemsize
    b_align = 16 if itemsize < 4 else 8              # bf16 packs 2 rows / sublane

    vmem_cap = _vmem_capacity_bytes()
    vmem_limit = min(int(vmem_cap * 0.78), 100 * 1024 * 1024)   # ~100 MiB v5e/v6e, ~50 MiB v7x
    budget = int(vmem_limit * 0.9)                              # compiler-scratch headroom

    # f32 biases as 2-D rows; MXU operands in compute_dtype.
    be = jnp.asarray(b_enc, jnp.float32).reshape(1, H)
    bd = jnp.asarray(b_dec, jnp.float32).reshape(1, D)
    x_c = jnp.asarray(x, compute_dtype)
    we = jnp.asarray(w_enc, compute_dtype)                      # (H, D) torch layout
    bias_bytes = 4 * (H + D) * 4

    # ---------------- Mode A: weights VMEM-resident -------------------------
    weights_vmem = 2 * (2 * D * H) * itemsize                   # both weights, dbl-buffered

    def mode_a_ws(tb):
        return (weights_vmem
                + 2 * tb * D * itemsize                         # x tile
                + 2 * tb * H * enc_itemsize                     # encoded output tile
                + 2 * tb * D * 4                                # reconstructed output tile
                + bias_bytes)

    use_resident = (block_h is None) and (weights_vmem + bias_bytes < budget)
    if use_resident:
        if block_b is not None:
            tb = block_b
        else:
            tb = _pick_tile(B, 512, b_align)
            # >= 2 tiles on the "parallel" batch axis (v7x: 2 TCs/chip); free
            # here since the resident weights are not re-streamed per tile.
            if tb == B and B % (2 * b_align) == 0:
                tb = _pick_tile(B, B // 2, b_align)
            while tb > b_align and mode_a_ws(tb) > budget:
                nt = tb // 2
                if nt >= b_align and nt % b_align == 0 and B % nt == 0:
                    tb = nt
                else:
                    break
        use_resident = (B % tb == 0) and (mode_a_ws(tb) <= budget)

    if use_resident:
        wd = jnp.asarray(w_dec, compute_dtype)                  # (D, H), no transpose
        rec, enc = pl.pallas_call(
            _sae_resident_kernel,
            out_shape=(jax.ShapeDtypeStruct((B, D), jnp.float32),
                       jax.ShapeDtypeStruct((B, H), encoded_dtype)),
            grid=(B // tb,),
            in_specs=[
                pl.BlockSpec((tb, D), lambda b: (b, 0)),        # x batch tile
                pl.BlockSpec((H, D), lambda b: (0, 0)),         # W_enc: constant idx -> DMA'd once
                pl.BlockSpec((1, H), lambda b: (0, 0)),         # b_enc
                pl.BlockSpec((D, H), lambda b: (0, 0)),         # W_dec: constant idx -> DMA'd once
                pl.BlockSpec((1, D), lambda b: (0, 0)),         # b_dec
            ],
            out_specs=(pl.BlockSpec((tb, D), lambda b: (b, 0)),
                       pl.BlockSpec((tb, H), lambda b: (b, 0))),
            compiler_params=pltpu.CompilerParams(
                dimension_semantics=("parallel",),
                vmem_limit_bytes=vmem_limit,
            ),
        )(x_c, we, be, wd, bd)
        return rec, enc

    # ---------------- Mode B: weights streamed in hidden panels -------------
    th = block_h if block_h is not None else _pick_tile(H, 256, 128)

    def mode_b_ws(tb):
        return (2 * (2 * th * D) * itemsize                     # W_enc + W_dec^T panels
                + 2 * tb * D * itemsize                         # x tile (resident across h)
                + 2 * tb * th * enc_itemsize                    # encoded output tile
                + 2 * tb * D * 4                                # rec output (resident acc)
                + bias_bytes)

    if block_b is not None:
        tb = block_b
    else:
        # Weight panels are re-streamed once per batch tile; tb must be large
        # enough that the schedule is MXU-bound, not HBM-bound (~768 on v6e,
        # ~384 is enough on the higher-bandwidth / smaller-VMEM v7x).
        preferred_tb = 768 if vmem_cap > 96 * 1024 * 1024 else 384
        tb = _pick_tile(B, preferred_tb, b_align)
        while tb > b_align and mode_b_ws(tb) > budget:
            nt = tb // 2
            if nt >= b_align and nt % b_align == 0 and B % nt == 0:
                tb = nt
            else:
                break
    assert B % tb == 0 and H % th == 0, "batch/hidden must divide the tile sizes"

    # One-time re-layout of W_dec to (H, D): the per-step decoder panel becomes
    # a contiguous (th, D) slab instead of D strided rows of th elements.
    wdt = jnp.asarray(w_dec, compute_dtype).T                   # (H, D)

    rec, enc = pl.pallas_call(
        _sae_streamed_kernel,
        out_shape=(jax.ShapeDtypeStruct((B, D), jnp.float32),
                   jax.ShapeDtypeStruct((B, H), encoded_dtype)),
        grid=(B // tb, H // th),                                # reduction axis last
        in_specs=[
            pl.BlockSpec((tb, D), lambda b, h: (b, 0)),         # x: resident across h
            pl.BlockSpec((th, D), lambda b, h: (h, 0)),         # W_enc panel
            pl.BlockSpec((1, th), lambda b, h: (0, h)),         # b_enc slice
            pl.BlockSpec((th, D), lambda b, h: (h, 0)),         # W_dec^T panel (contiguous)
            pl.BlockSpec((1, D), lambda b, h: (0, 0)),          # b_dec
        ],
        out_specs=(pl.BlockSpec((tb, D), lambda b, h: (b, 0)),   # rec: resident accumulator
                   pl.BlockSpec((tb, th), lambda b, h: (b, h))), # enc: one tile per step
        compiler_params=pltpu.CompilerParams(
            dimension_semantics=("parallel", "arbitrary"),
            vmem_limit_bytes=vmem_limit,
        ),
    )(x_c, we, be, wdt, bd)
    return rec, enc


# ---------------------------------------------------------------------------
# Self-test
# ---------------------------------------------------------------------------

if __name__ == "__main__":
    key = jax.random.PRNGKey(0)

    def make_inputs(k, B, D, H):
        kx, kwe, kbe, kwd, kbd = jax.random.split(k, 5)
        x = jax.random.normal(kx, (B, D), dtype=jnp.float32)
        w_enc = jax.random.normal(kwe, (H, D), dtype=jnp.float32) * 0.1
        b_enc = jax.random.normal(kbe, (H,), dtype=jnp.float32) * 0.1
        w_dec = jax.random.normal(kwd, (D, H), dtype=jnp.float32) * 0.1
        b_dec = jax.random.normal(kbd, (D,), dtype=jnp.float32) * 0.1
        return x, w_enc, b_enc, w_dec, b_dec

    def reference(x, w_enc, b_enc, w_dec, b_dec):
        enc = jnp.maximum(x @ w_enc.T + b_enc, 0.0)
        rec = enc @ w_dec.T + b_dec
        return rec, enc

    k1, k2, k3 = jax.random.split(key, 3)

    # 1) Module-default shapes (input_size=16, hidden_size=128), f32; force the
    #    resident-weight (Mode A) kernel even at these tiny sizes.
    args1 = make_inputs(k1, 8, 16, 128)
    rec1, enc1 = sparse_autoencoder_forward(*args1, force_pallas=True)
    jax.block_until_ready((rec1, enc1))
    rec1_r, enc1_r = reference(*args1)
    assert rec1.shape == (8, 16) and enc1.shape == (8, 128)
    assert jnp.allclose(enc1, enc1_r, atol=1e-4, rtol=1e-4)
    assert jnp.allclose(rec1, rec1_r, atol=1e-4, rtol=1e-4)

    # 2) Resident-weight kernel across several batch tiles: B=32, tb=8 -> grid (4,);
    #    the weight matrices are DMA'd once and reused for every batch tile.
    args2 = make_inputs(k2, 32, 16, 128)
    rec2, enc2 = sparse_autoencoder_forward(*args2, block_b=8, force_pallas=True)
    jax.block_until_ready((rec2, enc2))
    rec2_r, enc2_r = reference(*args2)
    assert jnp.allclose(enc2, enc2_r, atol=1e-4, rtol=1e-4)
    assert jnp.allclose(rec2, rec2_r, atol=1e-4, rtol=1e-4)

    # 3) Streamed (Mode B) kernel: hidden axis tiled, reconstruction accumulated
    #    directly in the resident output block.  B=32, H=256, tiles (8, 128) -> grid (4, 2).
    args3 = make_inputs(k3, 32, 16, 256)
    rec3, enc3 = sparse_autoencoder_forward(*args3, block_b=8, block_h=128,
                                            force_pallas=True)
    jax.block_until_ready((rec3, enc3))
    rec3_r, enc3_r = reference(*args3)
    assert jnp.allclose(enc3, enc3_r, atol=1e-4, rtol=1e-4)
    assert jnp.allclose(rec3, rec3_r, atol=1e-4, rtol=1e-4)

    # 4) bf16 MXU operands (f32 accumulation), resident-weight path — looser tolerance.
    rec4, enc4 = sparse_autoencoder_forward(*args2, compute_dtype=jnp.bfloat16,
                                            block_b=16, force_pallas=True)
    jax.block_until_ready((rec4, enc4))
    assert jnp.allclose(enc4, enc2_r, atol=5e-2, rtol=5e-2)
    assert jnp.allclose(rec4, rec2_r, atol=5e-2, rtol=5e-2)

    # 5) Tiny-shape XLA fallback path (default behaviour, no force_pallas).
    rec5, enc5 = sparse_autoencoder_forward(*args1)
    jax.block_until_ready((rec5, enc5))
    assert jnp.allclose(rec5, rec1_r, atol=1e-5, rtol=1e-5)
    assert jnp.allclose(enc5, enc1_r, atol=1e-5, rtol=1e-5)

    print("KERNEL_OK")
</pallas_src>

<mosaic_0001>
module attributes {stable_mosaic.version = 11 : i64} {
  func.func @_sae_resident_kernel(%arg0: i32, %arg1: memref<8x16xf32, #tpu.memory_space<vmem>>, %arg2: memref<128x16xf32, #tpu.memory_space<vmem>>, %arg3: memref<1x128xf32, #tpu.memory_space<vmem>>, %arg4: memref<16x128xf32, #tpu.memory_space<vmem>>, %arg5: memref<1x16xf32, #tpu.memory_space<vmem>>, %arg6: memref<8x16xf32, #tpu.memory_space<vmem>>, %arg7: memref<8x128xf32, #tpu.memory_space<vmem>>) attributes {dimension_semantics = [#tpu.dimension_semantics<parallel>], iteration_bounds = array<i64: 1>, scalar_prefetch = 0 : i64, scratch_operands = 0 : i64, tpu.core_type = #tpu.core_type<tc>, window_params = [{transform_indices = @transform_0, window_bounds = array<i64: 8, 16>}, {pipeline_mode = #tpu.pipeline_mode<synchronous>, transform_indices = @transform_1, window_bounds = array<i64: 128, 16>}, {pipeline_mode = #tpu.pipeline_mode<synchronous>, transform_indices = @transform_2, window_bounds = array<i64: 1, 128>}, {pipeline_mode = #tpu.pipeline_mode<synchronous>, transform_indices = @transform_3, window_bounds = array<i64: 16, 128>}, {pipeline_mode = #tpu.pipeline_mode<synchronous>, transform_indices = @transform_4, window_bounds = array<i64: 1, 16>}, {transform_indices = @transform_5, window_bounds = array<i64: 8, 16>}, {transform_indices = @transform_6, window_bounds = array<i64: 8, 128>}]} {
    %c0 = arith.constant 0 : index
    %c0_0 = arith.constant 0 : index
    %0 = vector.load %arg1[%c0, %c0_0] : memref<8x16xf32, #tpu.memory_space<vmem>>, vector<8x16xf32>
    %c0_1 = arith.constant 0 : index
    %c0_2 = arith.constant 0 : index
    %1 = vector.load %arg2[%c0_1, %c0_2] : memref<128x16xf32, #tpu.memory_space<vmem>>, vector<128x16xf32>
    %cst = arith.constant dense<0.000000e+00> : vector<8x128xf32>
    %2 = tpu.matmul %0, %1, %cst {dimension_numbers = #tpu.dot_dimension_numbers<[1], [1], [0], [0], [0, 0, 1, 0], [], []>} : vector<8x16xf32>, vector<128x16xf32>, vector<8x128xf32> -> vector<8x128xf32>
    %c0_3 = arith.constant 0 : index
    %c0_4 = arith.constant 0 : index
    %3 = vector.load %arg3[%c0_3, %c0_4] : memref<1x128xf32, #tpu.memory_space<vmem>>, vector<1x128xf32>
    %4 = vector.broadcast %3 : vector<1x128xf32> to vector<8x128xf32>
    %5 = arith.addf %2, %4 : vector<8x128xf32>
    %cst_5 = arith.constant 0.000000e+00 : f32
    %6 = vector.broadcast %cst_5 : f32 to vector<8x128xf32>
    %7 = arith.maximumf %5, %6 : vector<8x128xf32>
    %c0_6 = arith.constant 0 : index
    %c0_7 = arith.constant 0 : index
    %8 = vector.load %arg7[%c0_6, %c0_7] : memref<8x128xf32, #tpu.memory_space<vmem>>, vector<8x128xf32>
    tpu.vector_store %arg7[%c0_6, %c0_7], %7 {strides = array<i32>} : memref<8x128xf32, #tpu.memory_space<vmem>>, vector<8x128xf32>,
    %c0_8 = arith.constant 0 : index
    %c0_9 = arith.constant 0 : index
    %9 = vector.load %arg4[%c0_8, %c0_9] : memref<16x128xf32, #tpu.memory_space<vmem>>, vector<16x128xf32>
    %cst_10 = arith.constant dense<0.000000e+00> : vector<8x16xf32>
    %10 = tpu.matmul %7, %9, %cst_10 {dimension_numbers = #tpu.dot_dimension_numbers<[1], [1], [0], [0], [0, 0, 1, 0], [], []>} : vector<8x128xf32>, vector<16x128xf32>, vector<8x16xf32> -> vector<8x16xf32>
    %c0_11 = arith.constant 0 : index
    %c0_12 = arith.constant 0 : index
    %11 = vector.load %arg5[%c0_11, %c0_12] : memref<1x16xf32, #tpu.memory_space<vmem>>, vector<1x16xf32>
    %12 = vector.broadcast %11 : vector<1x16xf32> to vector<8x16xf32>
    %13 = arith.addf %10, %12 : vector<8x16xf32>
    %c0_13 = arith.constant 0 : index
    %c0_14 = arith.constant 0 : index
    %14 = vector.load %arg6[%c0_13, %c0_14] : memref<8x16xf32, #tpu.memory_space<vmem>>, vector<8x16xf32>
    tpu.vector_store %arg6[%c0_13, %c0_14], %13 {strides = array<i32>} : memref<8x16xf32, #tpu.memory_space<vmem>>, vector<8x16xf32>,
    return
  }
  func.func @transform_0(%arg0: i32) -> (i32, i32) {
    %c0_i32 = arith.constant 0 : i32
    %c0_i32_0 = arith.constant 0 : i32
    return %arg0, %c0_i32 : i32, i32
  }
  func.func @transform_1(%arg0: i32) -> (i32, i32) {
    %c0_i32 = arith.constant 0 : i32
    %c0_i32_0 = arith.constant 0 : i32
    %c0_i32_1 = arith.constant 0 : i32
    return %c0_i32, %c0_i32_0 : i32, i32
  }
  func.func @transform_2(%arg0: i32) -> (i32, i32) {
    %c0_i32 = arith.constant 0 : i32
    %c0_i32_0 = arith.constant 0 : i32
    %c0_i32_1 = arith.constant 0 : i32
    return %c0_i32, %c0_i32_0 : i32, i32
  }
  func.func @transform_3(%arg0: i32) -> (i32, i32) {
    %c0_i32 = arith.constant 0 : i32
    %c0_i32_0 = arith.constant 0 : i32
    %c0_i32_1 = arith.constant 0 : i32
    return %c0_i32, %c0_i32_0 : i32, i32
  }
  func.func @transform_4(%arg0: i32) -> (i32, i32) {
    %c0_i32 = arith.constant 0 : i32
    %c0_i32_0 = arith.constant 0 : i32
    %c0_i32_1 = arith.constant 0 : i32
    return %c0_i32, %c0_i32_0 : i32, i32
  }
  func.func @transform_5(%arg0: i32) -> (i32, i32) {
    %c0_i32 = arith.constant 0 : i32
    %c0_i32_0 = arith.constant 0 : i32
    return %arg0, %c0_i32 : i32, i32
  }
  func.func @transform_6(%arg0: i32) -> (i32, i32) {
    %c0_i32 = arith.constant 0 : i32
    %c0_i32_0 = arith.constant 0 : i32
    return %arg0, %c0_i32 : i32, i32
  }
}

</mosaic_0001>

<bundles_post_ra>
// kernel: tpu_custom_call.1
= control target key start
LH: loop header
LB: loop body
LE: loop exit
PB: predicated region body
PF: predicated region fallthrough
CT: control target
= control target key end

     0   :  { %12 = vsyncpa [#allocation3], 0  ;;  %vm48_vm0 = vcmask 130048   ;;  %v449_v2 = vmov 0.0|0.0   ;;  %vm450_vm2 = vmmov 0   ;;  %v451_v5 = vmov 0.0   ;;  %s600_s0 = inlined_call_operand.vmem [shape: f32[8,16], index: 0, kind: input, shape index: {}]   ;;  %s601_s1 = inlined_call_operand.vmem [shape: f32[128,16], index: 1, kind: input, shape index: {}]   ;;  %s602_s2 = inlined_call_operand.vmem [shape: f32[1,128], index: 2, kind: input, shape index: {}]   ;;  %s603_s3 = inlined_call_operand.vmem [shape: f32[16,128], index: 3, kind: input, shape index: {}]   ;;  %s604_s4 = inlined_call_operand.vmem [shape: f32[1,16], index: 4, kind: input, shape index: {}]   ;;  %s605_s5 = inlined_call_operand.hbm [shape: f32[8,16], index: 5, kind: output, shape index: {0}]   ;;  %s606_s6 = inlined_call_operand.hbm [shape: f32[8,128], index: 6, kind: output, shape index: {1}]  }
   0x1   :  { %v25_v0 = vld [vmem:[%s601_s1] sm:$0xff]  ;;  %v26_v1 = vld [vmem:[%s601_s1 + $0x8] sm:$0xff]  ;;  %361 = vmatprep.subr.bf16.mxu0 %v449_v2  ;;  %vm497_vm1 = vmpackc.low %vm48_vm0, %vm48_vm0  ;;  %393 = vmatprep.subr.bf16.mxu1 %v449_v2 }
   0x2   :  { %v362_v3 = vpack.c.bf16 %v26_v1, %v25_v0  ;;  %351 = vmatprep.mubr.msk.f32.mxu0 %vm450_vm2, %v451_v5  ;;  %358 = vmatprep.mubr.msk.f32.mxu1 %vm450_vm2, %v451_v5  ;;  %v27_v6 = vld [vmem:[%s601_s1 + $0x10] sm:$0xff]  ;;  %v28_v7 = vld [vmem:[%s601_s1 + $0x18] sm:$0xff]  ;;  %v172_v8 = vld [vmem:[%s603_s3] sm:$0xff] }
   0x3   :  { %v173_v9 = vld [vmem:[%s603_s3 + $0x8] sm:$0xff]  ;;  %v366_v10 = vpack.c.bf16 %v28_v7, %v27_v6 }
   0x4   :  { %364 = vmatpush3.bf16.xpose.msk.msra.mxu0 %vm497_vm1, %v362_v3  ;;  %v394_v11 = vpack.c.bf16 %v173_v9, %v172_v8 }
   0x5   :  { %365 = vmatprep.subr.bf16.mxu0 %v449_v2 }
   0x6   :  { %13 = vsyncpa [#allocation5], 0  ;;  %395 = vmatpush3.bf16.xpose.msra.mxu1 %v394_v11  ;;  %v29_v12 = vld [vmem:[%s601_s1 + $0x20] sm:$0xff]  ;;  %v30_v13 = vld [vmem:[%s601_s1 + $0x28] sm:$0xff] }
   0x7   :  { %v370_v14 = vpack.c.bf16 %v30_v13, %v29_v12  ;;  %v31_v15 = vld [vmem:[%s601_s1 + $0x30] sm:$0xff]  ;;  %v32_v16 = vld [vmem:[%s601_s1 + $0x38] sm:$0xff]  ;;  %v33_v18 = vld [vmem:[%s601_s1 + $0x40] sm:$0xff] }
   0x8   :  { %v374_v17 = vpack.c.bf16 %v32_v16, %v31_v15  ;;  %v34_v19 = vld [vmem:[%s601_s1 + $0x48] sm:$0xff]  ;;  %v35_v21 = vld [vmem:[%s601_s1 + $0x50] sm:$0xff]  ;;  %v36_v22 = vld [vmem:[%s601_s1 + $0x58] sm:$0xff] }
   0x9   :  { %v378_v20 = vpack.c.bf16 %v34_v19, %v33_v18  ;;  %v382_v23 = vpack.c.bf16 %v36_v22, %v35_v21  ;;  %v37_v24 = vld [vmem:[%s601_s1 + $0x60] sm:$0xff]  ;;  %v38_v25 = vld [vmem:[%s601_s1 + $0x68] sm:$0xff]  ;;  %v39_v27 = vld [vmem:[%s601_s1 + $0x70] sm:$0xff] }
   0xa   :  { %v386_v26 = vpack.c.bf16 %v38_v25, %v37_v24  ;;  %v40_v28 = vld [vmem:[%s601_s1 + $0x78] sm:$0xff]  ;;  %v24_v30 = vld [vmem:[%s600_s0] sm:$0xff]  ;;  %s452_s1 = smov [#allocation4]  }
   0xb   :  { %v390_v29 = vpack.c.bf16 %v40_v28, %v39_v27  ;;  %v280_v31 = vld [vmem:[%s602_s2] ss:$0 sm:$0xff]  ;;  %s268_s12 = sshll.u32 %s452_s1, 4  ;;  %s269_s12 = int_to_ptr.vmem [resolvable:$true] %s268_s12 }
   0xc   :  { %368 = vmatpush3.bf16.xpose.msk.msra.mxu0 %vm497_vm1, %v366_v10  ;;  %s401_s3 = scalar_lea.vmem %s269_s12, 128  ;;  %p406_p1 = scmp.lt.s32.totalorder %s269_s12, %s269_s12 }
   0xd   :  { %369 = vmatprep.subr.bf16.mxu0 %v449_v2  ;;  %p402_p0 = scmp.ne.s32.totalorder %s269_s12, %s401_s3  ;;  %p407_p2 = scmp.lt.s32.totalorder %s401_s3, %s401_s3 }
   0xf   :  { %p408_p3 = por %p407_p2, %p406_p1 }
  0x11   :  { %p409_p4 = pnand %p408_p3, %p402_p0 }
  0x14   :  { %372 = vmatpush3.bf16.xpose.msk.msra.mxu0 %vm497_vm1, %v370_v14 }
  0x15   :  { %373 = vmatprep.subr.bf16.mxu0 %v449_v2 }
  0x1c   :  { %376 = vmatpush3.bf16.xpose.msk.msra.mxu0 %vm497_vm1, %v374_v17 }
  0x1d   :  { %377 = vmatprep.subr.bf16.mxu0 %v449_v2 }
  0x24   :  { %380 = vmatpush3.bf16.xpose.msk.msra.mxu0 %vm497_vm1, %v378_v20 }
  0x25   :  { %381 = vmatprep.subr.bf16.mxu0 %v449_v2 }
  0x2c   :  { %384 = vmatpush3.bf16.xpose.msk.msra.mxu0 %vm497_vm1, %v382_v23 }
  0x2d   :  { %385 = vmatprep.subr.bf16.mxu0 %v449_v2 }
  0x34   :  { %388 = vmatpush3.bf16.xpose.msk.msra.mxu0 %vm497_vm1, %v386_v26 }
  0x35   :  { %389 = vmatprep.subr.bf16.mxu0 %v449_v2 }
  0x3c   :  { %392 = vmatpush3.bf16.xpose.msk.msra.mxu0 %vm497_vm1, %v390_v29 }
  0x43   :  { %352 = vmatmul.mubr.msk.f32.vlgmr.msra.gmra.mrb[0].mxu0 %vm48_vm0, %v24_v30 }
 0x116   :  { %v166_v32 = vpop.f32.mrb[0].mxu0 }
 0x117   :  { %v167_v33 = vadd.f32 %v280_v31, %v166_v32  ;;  %v353_v34 = vpop.f32.mrb[1].mxu0 }
 0x119   :  { %v170_v35 = vmax.f32 %v167_v33, 0.0 }
 0x11b   :  { %171 = vst [vmem:[#allocation4] sm:$0xff] %v170_v35  ;;  %359 = vmatmul.mubr.f32.vlgmr.msra.gmra.mrb[0].mxu1 %v170_v35 }
 0x11c   :  { %412 = shalt.err (!%p409_p4)
}
 0x11d   :  { %s413_s2 = scalar_lea.hbm %s606_s6, 128 }
 0x11e   :  { %p414_p5 = scmp.ne.s32.totalorder %s606_s6, %s413_s2  ;;  %p417_p6 = scmp.lt.u32.totalorder %s413_s2, %s606_s6 }
 0x120   :  { %p419_p7 = pnand %p417_p6, %p414_p5 }
 0x122   :  { %422 = shalt.err (!%p419_p7)
}
 0x123   :  { %271 = dma.vmem_to_hbm [thread:$0]  %s269_s12, 128, %s606_s6, [#allocation5]   ;;  %v298_v36 = vld [vmem:[%s604_s4] ss:$0 sm:$0xff] }
 0x124   :  { %s453_s22 = smov [#allocation2]  }
 0x125   :  { %s258_s23 = sshll.u32 %s453_s22, 4  ;;  %s259_s23 = int_to_ptr.vmem [resolvable:$true] %s258_s23 }
 0x126   :  { %s423_s24 = scalar_lea.vmem %s259_s23, 128  ;;  %p428_p9 = scmp.lt.s32.totalorder %s259_s23, %s259_s23 }
 0x127   :  { %p424_p8 = scmp.ne.s32.totalorder %s259_s23, %s423_s24  ;;  %p429_p10 = scmp.lt.s32.totalorder %s423_s24, %s423_s24 }
 0x129   :  { %p430_p11 = por %p429_p10, %p428_p9 }
 0x12b   :  { %p431_p12 = pnand %p430_p11, %p424_p8 }
 0x1ee   :  { %v247_v37 = vpop.f32.mrb[0].mxu1 }
 0x1ef   :  { %v248_v38 = vadd.f32 %v298_v36, %v247_v37  ;;  %v360_v39 = vpop.f32.mrb[1].mxu1 }
 0x1f1   :  { %251 = vst.msk [vmem:[#allocation2] sm:$0xff] %vm48_vm0, %v248_v38 }
 0x1f2   :  { %434 = shalt.err (!%p431_p12)
}
 0x1f3   :  { %s435_s26 = scalar_lea.hbm %s605_s5, 128 }
 0x1f4   :  { %p436_p13 = scmp.ne.s32.totalorder %s605_s5, %s435_s26  ;;  %p439_p0 = scmp.lt.u32.totalorder %s435_s26, %s605_s5 }
 0x1f6   :  { %p441_p1 = pnand %p439_p0, %p436_p13 }
 0x1f8   :  { %444 = shalt.err (!%p441_p1)
}
 0x1f9   :  { %261 = dma.vmem_to_hbm [thread:$0]  %s259_s23, 128, %s605_s5, [#allocation3]  }
 0x1fa   :  { %445 = dma.done.wait [#allocation3], 128  }
 0x1fb   :  { %446 = vsyncadd [#allocation3], 4294967168 }
 0x1fc   :  { %447 = dma.done.wait [#allocation5], 128  }
 0x1fd   :  { %448 = vsyncadd [#allocation5], 4294967168 }
 0x1fe   :  { %278 = vsyncpa [#allocation3], 1 }
 0x1ff   :  { %279 = vsyncpa [#allocation5], 1 }

</bundles_post_ra>
